<compile_context>
chip_gen: v6e
topology: v6e:2x2x1
jax: 0.10.0
libtpu: 0.0.40
codegen_flags: <defaults>
</compile_context>

<pallas_src>
import functools

import jax
import jax.numpy as jnp
from jax import lax
from jax.experimental import pallas as pl
from jax.experimental.pallas import tpu as pltpu


def _make_output_block_kernel(act_func, N, BT_tile, c_out, eps):
    """Kernel body for one BT tile (M_tile = BT_tile * N lanes)."""
    gated = act_func in ("glu", "gtu")
    inv_nc = 1.0 / float(N * c_out)

    def kernel(*refs):
        if gated:
            (x_ref, wp_ref, wq_ref, bp_ref, bq_ref, gam_ref, bet_ref,
             e_ref, et_ref, w1_ref, b1_ref, w2_ref, b2_ref, out_ref) = refs
        else:
            (x_ref, wp_ref, bp_ref, gam_ref, bet_ref,
             e_ref, et_ref, w1_ref, b1_ref, w2_ref, b2_ref, out_ref) = refs

        x = x_ref[...]                                       # (Kt*c_in, M) bf16

        # ---- temporal causal conv (+ folded Align residual): one deep MXU pass
        p = jnp.dot(wp_ref[...], x,
                    preferred_element_type=jnp.float32) + bp_ref[...]   # (c_out, M)

        # ---- gated / plain activation (f32, lane-dense)
        if act_func in ("glu", "gtu"):
            q = jnp.dot(wq_ref[...], x,
                        preferred_element_type=jnp.float32) + bq_ref[...]
            if act_func == "glu":
                h = p * jax.nn.sigmoid(q)
            else:
                h = jnp.tanh(p) * jax.nn.sigmoid(q)
        elif act_func == "relu":
            h = jnp.maximum(p, 0.0)
        elif act_func == "silu":
            h = p * jax.nn.sigmoid(p)
        else:
            raise NotImplementedError(act_func)

        # ---- LayerNorm over the joint (N, c_out) group of each (b, t)
        # One-pass stats.  Group reductions over the N-lane blocks are done with
        # small aligned matmuls against the 0/1 indicator E (M, BT) / E^T (BT, M),
        # so there are no in-kernel reshapes or lane relayouts.
        g1 = jnp.dot(h, e_ref[...], preferred_element_type=jnp.float32)      # (c_out, BT)
        g2 = jnp.dot(h * h, e_ref[...], preferred_element_type=jnp.float32)  # (c_out, BT)
        mu_g = jnp.sum(g1, axis=0, keepdims=True) * inv_nc                   # (1, BT)
        ms_g = jnp.sum(g2, axis=0, keepdims=True) * inv_nc
        rstd_g = lax.rsqrt(ms_g - mu_g * mu_g + eps)                         # (1, BT)
        mu = jnp.dot(jnp.broadcast_to(mu_g, (c_out, BT_tile)), et_ref[...],
                     preferred_element_type=jnp.float32)                     # (c_out, M)
        rstd = jnp.dot(jnp.broadcast_to(rstd_g, (c_out, BT_tile)), et_ref[...],
                       preferred_element_type=jnp.float32)                   # (c_out, M)
        hn = (h - mu) * rstd * gam_ref[...] + bet_ref[...]                   # (c_out, M)

        # ---- fc1 -> ReLU -> Dropout(identity in eval) -> fc2
        # TODO(synk): nn.Dropout is identity at inference; training-mode RNG drop
        # is not implemented.
        y1 = jnp.maximum(
            jnp.dot(w1_ref[...], hn.astype(jnp.bfloat16),
                    preferred_element_type=jnp.float32) + b1_ref[...], 0.0)   # (c1, M)
        y2 = jnp.dot(w2_ref[...], y1.astype(jnp.bfloat16),
                     preferred_element_type=jnp.float32) + b2_ref[...]        # (c_end, M)

        out_ref[...] = y2.astype(out_ref.dtype)              # lane-dense store

    return kernel


def _choose_bt_tile(BT_total, N, Kt, c_in, c_conv, c_out, c1, c_end,
                    vmem_budget_bytes):
    """Largest BT tile (whole LayerNorm groups) whose lane width is a multiple
    of 128 and whose working set fits the VMEM budget, keeping >= 2 tiles so
    both v7x TensorCores get work.  Falls back to one full-extent block."""
    per_group = N * (
        2 * 2 * Kt * c_in                    # bf16 x block, double-buffered
        + 2 * 4 * c_end                      # f32 out block, double-buffered
        + 4 * (c_conv + 3 * c_out + c1)      # f32 intermediates (p, q, h, hn, y1)
        + 4 * 2 * c_out                      # resident pre-tiled LN gamma / beta
    )
    cap = max(1, vmem_budget_bytes // per_group)
    if BT_total >= 2:
        cap = min(cap, BT_total // 2)        # >= 2 tiles: keep both v7x TCs busy
    divisors = [d for d in range(1, BT_total + 1) if BT_total % d == 0]
    good = [d for d in divisors if d <= cap and (d * N) % 128 == 0]
    if good:
        return max(good)
    # No 128-lane-aligned tiling available: single full-extent block (a block
    # whose last dim equals the array dim is always legal).
    return BT_total


def output_block_forward(x_nchw, params, *, Ko, c_out, act_func, eps=1e-5,
                         vmem_budget_bytes=24 * 1024 * 1024):
    """x_nchw: (B, c_in, T, N) float32.  Returns (B, end_channel, T-Ko+1, N)."""
    B, c_in, T, N = x_nchw.shape
    T_out = T - Ko + 1
    wa, ba, wc, bc, lng, lnb, w1, b1, w2, b2 = params
    c_conv = wc.shape[-1]
    c1 = w1.shape[-1]
    c_end = w2.shape[-1]
    gated = act_func in ("glu", "gtu")

    BT_total = B * T_out
    M_total = BT_total * N

    # ---- wrapper-side im2col into the transposed (C, M) layout --------------
    # TODO(synk): in a full STGCN model keep activations in this layout between
    # blocks so this relayout fuses into the producer instead of costing an
    # extra HBM round trip here.
    slabs = [
        jnp.transpose(x_nchw[:, :, kt:kt + T_out, :], (1, 0, 2, 3))
           .reshape(c_in, M_total)
        for kt in range(Ko)
    ]
    x_cm = jnp.concatenate(slabs, axis=0).astype(jnp.bfloat16)   # (Ko*c_in, M)

    # ---- conv weights in (out, Ko*c_in) layout, Align folded in -------------
    w_conv = jnp.transpose(wc, (2, 0, 1)).reshape(c_conv, Ko * c_in)
    w_conv = w_conv.astype(jnp.float32)
    bc_f = bc.astype(jnp.float32)
    if gated:
        w_p, w_q = w_conv[:c_out], w_conv[c_out:]
        b_p, b_q = bc_f[:c_out], bc_f[c_out:]
    else:
        w_p, b_p = w_conv, bc_f
        w_q = b_q = None
    # The Align residual (identity / zero-pad / 1x1 conv) is linear in x:
    # fold it into the P-branch weights of the last temporal tap.
    w_p = w_p.at[:, (Ko - 1) * c_in:].add(wa.astype(jnp.float32).T)
    b_p = b_p + ba.astype(jnp.float32)

    # ---- tile selection + resident small operands ---------------------------
    BT_tile = _choose_bt_tile(BT_total, N, Ko, c_in, c_conv, c_out, c1, c_end,
                              vmem_budget_bytes)
    M_tile = BT_tile * N
    num_tiles = M_total // M_tile

    # LayerNorm affine, pre-tiled to the per-tile (c_out, M_tile) lane pattern.
    gamma_t = jnp.tile(lng.astype(jnp.float32).T, (1, BT_tile))   # (c_out, M_tile)
    beta_t = jnp.tile(lnb.astype(jnp.float32).T, (1, BT_tile))
    # TODO(synk): if N is padded to a lane-friendly size for real graphs, mask
    # the padded vertices out of E (and zero gamma_t there) so LN stats stay exact.

    # 0/1 indicator of which (b, t) LayerNorm group each lane belongs to.
    group_of_lane = jnp.arange(M_tile) // N
    e_mat = (group_of_lane[:, None] == jnp.arange(BT_tile)[None, :]
             ).astype(jnp.float32)                                # (M_tile, BT_tile)
    e_mat_t = e_mat.T                                             # (BT_tile, M_tile)

    wp_b = w_p.astype(jnp.bfloat16)
    bp2 = b_p.reshape(c_out, 1)
    w1t = w1.astype(jnp.float32).T.astype(jnp.bfloat16)           # (c1, c_out)
    b12 = b1.astype(jnp.float32).reshape(c1, 1)
    w2t = w2.astype(jnp.float32).T.astype(jnp.bfloat16)           # (c_end, c1)
    b22 = b2.astype(jnp.float32).reshape(c_end, 1)

    if gated:
        wq_b = w_q.astype(jnp.bfloat16)
        bq2 = b_q.reshape(c_out, 1)
        args = (x_cm, wp_b, wq_b, bp2, bq2, gamma_t, beta_t, e_mat, e_mat_t,
                w1t, b12, w2t, b22)
    else:
        args = (x_cm, wp_b, bp2, gamma_t, beta_t, e_mat, e_mat_t,
                w1t, b12, w2t, b22)

    def _full(arr):  # resident, un-tiled operand (weights / LN affine / E)
        return pl.BlockSpec(arr.shape, lambda g: (0, 0))

    x_spec = pl.BlockSpec((Ko * c_in, M_tile), lambda g: (0, g))
    out_spec = pl.BlockSpec((c_end, M_tile), lambda g: (0, g))
    in_specs = [x_spec] + [_full(a) for a in args[1:]]

    kernel = _make_output_block_kernel(act_func, N, BT_tile, c_out, eps)

    out = pl.pallas_call(
        kernel,
        out_shape=jax.ShapeDtypeStruct((c_end, M_total), jnp.float32),
        grid_spec=pltpu.PrefetchScalarGridSpec(
            num_scalar_prefetch=0,
            grid=(num_tiles,),
            in_specs=in_specs,
            out_specs=out_spec,
        ),
        # If the "parallel" axis does not shard across v7x's two TensorCores,
        # switch to pltpu.CORE_PARALLEL on a leading core axis.
        compiler_params=pltpu.CompilerParams(
            dimension_semantics=("parallel",),
            vmem_limit_bytes=48 * 1024 * 1024,
        ),
    )(*args)

    # (c_end, B*T_out*N) -> PyTorch output layout (B, c_end, T_out, N)
    out = out.reshape(c_end, B, T_out, N)
    return jnp.transpose(out, (1, 0, 2, 3))


def output_block_reference(x_nchw, params, *, Ko, c_out, act_func, eps=1e-5):
    """Pure-JAX f32 reference mirroring the PyTorch forward (eval mode)."""
    wa, ba, wc, bc, lng, lnb, w1, b1, w2, b2 = params
    x = jnp.transpose(x_nchw, (0, 2, 3, 1)).astype(jnp.float32)   # (B,T,N,Cin)
    T = x.shape[1]
    T_out = T - Ko + 1

    conv = sum(jnp.einsum("btnc,cd->btnd", x[:, kt:kt + T_out], wc[kt])
               for kt in range(Ko)) + bc
    x_in = jnp.einsum("btnc,cd->btnd", x[:, Ko - 1:], wa) + ba

    if act_func == "glu":
        h = (conv[..., :c_out] + x_in) * jax.nn.sigmoid(conv[..., c_out:])
    elif act_func == "gtu":
        h = jnp.tanh(conv[..., :c_out] + x_in) * jax.nn.sigmoid(conv[..., c_out:])
    elif act_func == "relu":
        h = jnp.maximum(conv + x_in, 0.0)
    else:  # silu
        z = conv + x_in
        h = z * jax.nn.sigmoid(z)

    mu = h.mean(axis=(2, 3), keepdims=True)
    var = ((h - mu) ** 2).mean(axis=(2, 3), keepdims=True)
    hn = (h - mu) * jax.lax.rsqrt(var + eps) * lng + lnb

    y1 = jnp.maximum(hn @ w1 + b1, 0.0)
    y2 = y1 @ w2 + b2
    return jnp.transpose(y2, (0, 3, 1, 2))


if __name__ == "__main__":
    # Module config (small, consistent with OutputBlock.__init__)
    B, T, N = 2, 10, 16           # batch, timesteps, n_vertex
    Ko = 3                        # remaining temporal kernel size
    last_block_channel = 8        # c_in
    channels = [32, 16]           # [temporal_1, fully_connected_1]
    end_channel = 1
    act_func = "glu"
    eps = 1e-5

    c_in, c0, c1 = last_block_channel, channels[0], channels[1]
    c_conv = 2 * c0 if act_func in ("glu", "gtu") else c0

    key = jax.random.PRNGKey(0)
    ks = jax.random.split(key, 12)

    # Input (PyTorch NCHW): (B, c_in, T, N)
    x_nchw = jax.random.normal(ks[0], (B, c_in, T, N), jnp.float32)

    # --- deterministic parameter init (shapes follow the PyTorch module) ---
    # CausalConv2d weight: (c_conv, c_in, Ko, 1) -> per-tap (Ko, c_in, c_conv)
    w_conv_pt = 0.1 * jax.random.normal(ks[1], (c_conv, c_in, Ko, 1), jnp.float32)
    b_conv = 0.1 * jax.random.normal(ks[2], (c_conv,), jnp.float32)
    wc = jnp.transpose(w_conv_pt[:, :, :, 0], (2, 1, 0))          # (Ko, c_in, c_conv)

    # Align expressed as a matmul (c_in, c0)
    if c_in > c0:
        w_align_pt = 0.1 * jax.random.normal(ks[3], (c0, c_in, 1, 1), jnp.float32)
        b_align = 0.1 * jax.random.normal(ks[4], (c0,), jnp.float32)
        wa = jnp.transpose(w_align_pt[:, :, 0, 0], (1, 0))        # (c_in, c0)
        ba = b_align
    elif c_in < c0:
        wa = jnp.concatenate(
            [jnp.eye(c_in, dtype=jnp.float32),
             jnp.zeros((c_in, c0 - c_in), jnp.float32)], axis=1)  # zero-pad channels
        ba = jnp.zeros((c0,), jnp.float32)
    else:
        wa = jnp.eye(c_in, dtype=jnp.float32)
        ba = jnp.zeros((c0,), jnp.float32)

    # LayerNorm([n_vertex, c0]) affine params (randomized to exercise the path)
    lng = 1.0 + 0.1 * jax.random.normal(ks[5], (N, c0), jnp.float32)
    lnb = 0.1 * jax.random.normal(ks[6], (N, c0), jnp.float32)

    # fc1: Linear(c0 -> c1), fc2: Linear(c1 -> end_channel); stored as (in, out)
    w1 = 0.1 * jax.random.normal(ks[7], (c1, c0), jnp.float32).T   # (c0, c1)
    b1 = 0.1 * jax.random.normal(ks[8], (c1,), jnp.float32)
    w2 = 0.1 * jax.random.normal(ks[9], (end_channel, c1), jnp.float32).T  # (c1, end)
    b2 = 0.1 * jax.random.normal(ks[10], (end_channel,), jnp.float32)

    params = (wa, ba, wc, b_conv, lng, lnb, w1, b1, w2, b2)

    fwd = functools.partial(output_block_forward, Ko=Ko, c_out=c0,
                            act_func=act_func, eps=eps)
    out = jax.block_until_ready(jax.jit(fwd)(x_nchw, params))

    ref = output_block_reference(x_nchw, params, Ko=Ko, c_out=c0,
                                 act_func=act_func, eps=eps)
    assert out.shape == (B, end_channel, T - Ko + 1, N), out.shape
    # bf16 matmul operands (f32 accumulation) -> loosened tolerance vs f32 reference
    assert jnp.allclose(out, ref, rtol=5e-2, atol=5e-2), \
        f"max abs err {jnp.max(jnp.abs(out - ref))}"

    print("KERNEL_OK")
</pallas_src>

<mosaic_0001>
module attributes {stable_mosaic.version = 11 : i64} {
  func.func @kernel(%arg0: i32, %arg1: memref<24x128xbf16, #tpu.memory_space<vmem>>, %arg2: memref<32x24xbf16, #tpu.memory_space<vmem>>, %arg3: memref<32x24xbf16, #tpu.memory_space<vmem>>, %arg4: memref<32x1xf32, #tpu.memory_space<vmem>>, %arg5: memref<32x1xf32, #tpu.memory_space<vmem>>, %arg6: memref<32x128xf32, #tpu.memory_space<vmem>>, %arg7: memref<32x128xf32, #tpu.memory_space<vmem>>, %arg8: memref<128x8xf32, #tpu.memory_space<vmem>>, %arg9: memref<8x128xf32, #tpu.memory_space<vmem>>, %arg10: memref<16x32xbf16, #tpu.memory_space<vmem>>, %arg11: memref<16x1xf32, #tpu.memory_space<vmem>>, %arg12: memref<1x16xbf16, #tpu.memory_space<vmem>>, %arg13: memref<1x1xf32, #tpu.memory_space<vmem>>, %arg14: memref<1x128xf32, #tpu.memory_space<vmem>>) attributes {dimension_semantics = [#tpu.dimension_semantics<parallel>], iteration_bounds = array<i64: 2>, scalar_prefetch = 0 : i64, scratch_operands = 0 : i64, tpu.core_type = #tpu.core_type<tc>, window_params = [{transform_indices = @transform_0, window_bounds = array<i64: 24, 128>}, {pipeline_mode = #tpu.pipeline_mode<synchronous>, transform_indices = @transform_1, window_bounds = array<i64: 32, 24>}, {pipeline_mode = #tpu.pipeline_mode<synchronous>, transform_indices = @transform_2, window_bounds = array<i64: 32, 24>}, {pipeline_mode = #tpu.pipeline_mode<synchronous>, transform_indices = @transform_3, window_bounds = array<i64: 32, 1>}, {pipeline_mode = #tpu.pipeline_mode<synchronous>, transform_indices = @transform_4, window_bounds = array<i64: 32, 1>}, {pipeline_mode = #tpu.pipeline_mode<synchronous>, transform_indices = @transform_5, window_bounds = array<i64: 32, 128>}, {pipeline_mode = #tpu.pipeline_mode<synchronous>, transform_indices = @transform_6, window_bounds = array<i64: 32, 128>}, {pipeline_mode = #tpu.pipeline_mode<synchronous>, transform_indices = @transform_7, window_bounds = array<i64: 128, 8>}, {pipeline_mode = #tpu.pipeline_mode<synchronous>, transform_indices = @transform_8, window_bounds = array<i64: 8, 128>}, {pipeline_mode = #tpu.pipeline_mode<synchronous>, transform_indices = @transform_9, window_bounds = array<i64: 16, 32>}, {pipeline_mode = #tpu.pipeline_mode<synchronous>, transform_indices = @transform_10, window_bounds = array<i64: 16, 1>}, {pipeline_mode = #tpu.pipeline_mode<synchronous>, transform_indices = @transform_11, window_bounds = array<i64: 1, 16>}, {pipeline_mode = #tpu.pipeline_mode<synchronous>, transform_indices = @transform_12, window_bounds = array<i64: 1, 1>}, {transform_indices = @transform_13, window_bounds = array<i64: 1, 128>}]} {
    %c0 = arith.constant 0 : index
    %c0_0 = arith.constant 0 : index
    %0 = vector.load %arg1[%c0, %c0_0] : memref<24x128xbf16, #tpu.memory_space<vmem>>, vector<24x128xbf16>
    %c0_1 = arith.constant 0 : index
    %c0_2 = arith.constant 0 : index
    %1 = vector.load %arg2[%c0_1, %c0_2] : memref<32x24xbf16, #tpu.memory_space<vmem>>, vector<32x24xbf16>
    %cst = arith.constant dense<0.000000e+00> : vector<32x128xf32>
    %2 = tpu.matmul %1, %0, %cst {dimension_numbers = #tpu.dot_dimension_numbers<[1], [0], [0], [1], [0, 0, 1, 1], [], []>} : vector<32x24xbf16>, vector<24x128xbf16>, vector<32x128xf32> -> vector<32x128xf32>
    %c0_3 = arith.constant 0 : index
    %c0_4 = arith.constant 0 : index
    %3 = vector.load %arg4[%c0_3, %c0_4] : memref<32x1xf32, #tpu.memory_space<vmem>>, vector<32x1xf32>
    %4 = vector.broadcast %3 : vector<32x1xf32> to vector<32x128xf32>
    %5 = arith.addf %2, %4 : vector<32x128xf32>
    %c0_5 = arith.constant 0 : index
    %c0_6 = arith.constant 0 : index
    %6 = vector.load %arg3[%c0_5, %c0_6] : memref<32x24xbf16, #tpu.memory_space<vmem>>, vector<32x24xbf16>
    %cst_7 = arith.constant dense<0.000000e+00> : vector<32x128xf32>
    %7 = tpu.matmul %6, %0, %cst_7 {dimension_numbers = #tpu.dot_dimension_numbers<[1], [0], [0], [1], [0, 0, 1, 1], [], []>} : vector<32x24xbf16>, vector<24x128xbf16>, vector<32x128xf32> -> vector<32x128xf32>
    %c0_8 = arith.constant 0 : index
    %c0_9 = arith.constant 0 : index
    %8 = vector.load %arg5[%c0_8, %c0_9] : memref<32x1xf32, #tpu.memory_space<vmem>>, vector<32x1xf32>
    %9 = vector.broadcast %8 : vector<32x1xf32> to vector<32x128xf32>
    %10 = arith.addf %7, %9 : vector<32x128xf32>
    %11 = arith.negf %10 : vector<32x128xf32>
    %12 = math.exp %11 : vector<32x128xf32>
    %cst_10 = arith.constant 1.000000e+00 : f32
    %13 = vector.broadcast %cst_10 : f32 to vector<32x128xf32>
    %14 = arith.addf %13, %12 : vector<32x128xf32>
    %15 = arith.divf %13, %14 : vector<32x128xf32>
    %16 = arith.mulf %5, %15 : vector<32x128xf32>
    %c0_11 = arith.constant 0 : index
    %c0_12 = arith.constant 0 : index
    %17 = vector.load %arg8[%c0_11, %c0_12] : memref<128x8xf32, #tpu.memory_space<vmem>>, vector<128x8xf32>
    %cst_13 = arith.constant dense<0.000000e+00> : vector<32x8xf32>
    %18 = tpu.matmul %16, %17, %cst_13 {dimension_numbers = #tpu.dot_dimension_numbers<[1], [0], [0], [1], [0, 0, 1, 1], [], []>} : vector<32x128xf32>, vector<128x8xf32>, vector<32x8xf32> -> vector<32x8xf32>
    %19 = arith.mulf %16, %16 : vector<32x128xf32>
    %c0_14 = arith.constant 0 : index
    %c0_15 = arith.constant 0 : index
    %20 = vector.load %arg8[%c0_14, %c0_15] : memref<128x8xf32, #tpu.memory_space<vmem>>, vector<128x8xf32>
    %cst_16 = arith.constant dense<0.000000e+00> : vector<32x8xf32>
    %21 = tpu.matmul %19, %20, %cst_16 {dimension_numbers = #tpu.dot_dimension_numbers<[1], [0], [0], [1], [0, 0, 1, 1], [], []>} : vector<32x128xf32>, vector<128x8xf32>, vector<32x8xf32> -> vector<32x8xf32>
    %cst_17 = arith.constant dense<0.000000e+00> : vector<8xf32>
    %22 = vector.multi_reduction <add>, %18, %cst_17 [0] : vector<32x8xf32> to vector<8xf32>
    %23 = vector.shape_cast %22 : vector<8xf32> to vector<1x8xf32>
    %cst_18 = arith.constant 0.001953125 : f32
    %24 = vector.broadcast %cst_18 : f32 to vector<1x8xf32>
    %25 = arith.mulf %23, %24 : vector<1x8xf32>
    %cst_19 = arith.constant dense<0.000000e+00> : vector<8xf32>
    %26 = vector.multi_reduction <add>, %21, %cst_19 [0] : vector<32x8xf32> to vector<8xf32>
    %27 = vector.shape_cast %26 : vector<8xf32> to vector<1x8xf32>
    %cst_20 = arith.constant 0.001953125 : f32
    %28 = vector.broadcast %cst_20 : f32 to vector<1x8xf32>
    %29 = arith.mulf %27, %28 : vector<1x8xf32>
    %30 = arith.mulf %25, %25 : vector<1x8xf32>
    %31 = arith.subf %29, %30 : vector<1x8xf32>
    %cst_21 = arith.constant 9.99999974E-6 : f32
    %32 = vector.broadcast %cst_21 : f32 to vector<1x8xf32>
    %33 = arith.addf %31, %32 : vector<1x8xf32>
    %34 = math.rsqrt %33 : vector<1x8xf32>
    %35 = vector.shape_cast %25 : vector<1x8xf32> to vector<1x8xf32>
    %36 = vector.broadcast %35 : vector<1x8xf32> to vector<32x8xf32>
    %c0_22 = arith.constant 0 : index
    %c0_23 = arith.constant 0 : index
    %37 = vector.load %arg9[%c0_22, %c0_23] : memref<8x128xf32, #tpu.memory_space<vmem>>, vector<8x128xf32>
    %cst_24 = arith.constant dense<0.000000e+00> : vector<32x128xf32>
    %38 = tpu.matmul %36, %37, %cst_24 {dimension_numbers = #tpu.dot_dimension_numbers<[1], [0], [0], [1], [0, 0, 1, 1], [], []>} : vector<32x8xf32>, vector<8x128xf32>, vector<32x128xf32> -> vector<32x128xf32>
    %39 = vector.shape_cast %34 : vector<1x8xf32> to vector<1x8xf32>
    %40 = vector.broadcast %39 : vector<1x8xf32> to vector<32x8xf32>
    %c0_25 = arith.constant 0 : index
    %c0_26 = arith.constant 0 : index
    %41 = vector.load %arg9[%c0_25, %c0_26] : memref<8x128xf32, #tpu.memory_space<vmem>>, vector<8x128xf32>
    %cst_27 = arith.constant dense<0.000000e+00> : vector<32x128xf32>
    %42 = tpu.matmul %40, %41, %cst_27 {dimension_numbers = #tpu.dot_dimension_numbers<[1], [0], [0], [1], [0, 0, 1, 1], [], []>} : vector<32x8xf32>, vector<8x128xf32>, vector<32x128xf32> -> vector<32x128xf32>
    %43 = arith.subf %16, %38 : vector<32x128xf32>
    %44 = arith.mulf %43, %42 : vector<32x128xf32>
    %c0_28 = arith.constant 0 : index
    %c0_29 = arith.constant 0 : index
    %45 = vector.load %arg6[%c0_28, %c0_29] : memref<32x128xf32, #tpu.memory_space<vmem>>, vector<32x128xf32>
    %46 = arith.mulf %44, %45 : vector<32x128xf32>
    %c0_30 = arith.constant 0 : index
    %c0_31 = arith.constant 0 : index
    %47 = vector.load %arg7[%c0_30, %c0_31] : memref<32x128xf32, #tpu.memory_space<vmem>>, vector<32x128xf32>
    %48 = arith.addf %46, %47 : vector<32x128xf32>
    %c0_32 = arith.constant 0 : index
    %c0_33 = arith.constant 0 : index
    %49 = vector.load %arg10[%c0_32, %c0_33] : memref<16x32xbf16, #tpu.memory_space<vmem>>, vector<16x32xbf16>
    %50 = arith.truncf %48 : vector<32x128xf32> to vector<32x128xbf16>
    %cst_34 = arith.constant dense<0.000000e+00> : vector<16x128xf32>
    %51 = tpu.matmul %49, %50, %cst_34 {dimension_numbers = #tpu.dot_dimension_numbers<[1], [0], [0], [1], [0, 0, 1, 1], [], []>} : vector<16x32xbf16>, vector<32x128xbf16>, vector<16x128xf32> -> vector<16x128xf32>
    %c0_35 = arith.constant 0 : index
    %c0_36 = arith.constant 0 : index
    %52 = vector.load %arg11[%c0_35, %c0_36] : memref<16x1xf32, #tpu.memory_space<vmem>>, vector<16x1xf32>
    %53 = vector.broadcast %52 : vector<16x1xf32> to vector<16x128xf32>
    %54 = arith.addf %51, %53 : vector<16x128xf32>
    %cst_37 = arith.constant 0.000000e+00 : f32
    %55 = vector.broadcast %cst_37 : f32 to vector<16x128xf32>
    %56 = arith.maximumf %54, %55 : vector<16x128xf32>
    %c0_38 = arith.constant 0 : index
    %c0_39 = arith.constant 0 : index
    %57 = vector.load %arg12[%c0_38, %c0_39] : memref<1x16xbf16, #tpu.memory_space<vmem>>, vector<1x16xbf16>
    %58 = arith.truncf %56 : vector<16x128xf32> to vector<16x128xbf16>
    %cst_40 = arith.constant dense<0.000000e+00> : vector<1x128xf32>
    %59 = tpu.matmul %57, %58, %cst_40 {dimension_numbers = #tpu.dot_dimension_numbers<[1], [0], [0], [1], [0, 0, 1, 1], [], []>} : vector<1x16xbf16>, vector<16x128xbf16>, vector<1x128xf32> -> vector<1x128xf32>
    %c0_41 = arith.constant 0 : index
    %c0_42 = arith.constant 0 : index
    %60 = vector.load %arg13[%c0_41, %c0_42] : memref<1x1xf32, #tpu.memory_space<vmem>>, vector<1x1xf32>
    %61 = vector.broadcast %60 : vector<1x1xf32> to vector<1x128xf32>
    %62 = arith.addf %59, %61 : vector<1x128xf32>
    %c0_43 = arith.constant 0 : index
    %c0_44 = arith.constant 0 : index
    %63 = vector.load %arg14[%c0_43, %c0_44] : memref<1x128xf32, #tpu.memory_space<vmem>>, vector<1x128xf32>
    tpu.vector_store %arg14[%c0_43, %c0_44], %62 {strides = array<i32>} : memref<1x128xf32, #tpu.memory_space<vmem>>, vector<1x128xf32>,
    return
  }
  func.func @transform_0(%arg0: i32) -> (i32, i32) {
    %c0_i32 = arith.constant 0 : i32
    %c0_i32_0 = arith.constant 0 : i32
    return %c0_i32, %arg0 : i32, i32
  }
  func.func @transform_1(%arg0: i32) -> (i32, i32) {
    %c0_i32 = arith.constant 0 : i32
    %c0_i32_0 = arith.constant 0 : i32
    %c0_i32_1 = arith.constant 0 : i32
    return %c0_i32, %c0_i32_0 : i32, i32
  }
  func.func @transform_2(%arg0: i32) -> (i32, i32) {
    %c0_i32 = arith.constant 0 : i32
    %c0_i32_0 = arith.constant 0 : i32
    %c0_i32_1 = arith.constant 0 : i32
    return %c0_i32, %c0_i32_0 : i32, i32
  }
  func.func @transform_3(%arg0: i32) -> (i32, i32) {
    %c0_i32 = arith.constant 0 : i32
    %c0_i32_0 = arith.constant 0 : i32
    %c0_i32_1 = arith.constant 0 : i32
    return %c0_i32, %c0_i32_0 : i32, i32
  }
  func.func @transform_4(%arg0: i32) -> (i32, i32) {
    %c0_i32 = arith.constant 0 : i32
    %c0_i32_0 = arith.constant 0 : i32
    %c0_i32_1 = arith.constant 0 : i32
    return %c0_i32, %c0_i32_0 : i32, i32
  }
  func.func @transform_5(%arg0: i32) -> (i32, i32) {
    %c0_i32 = arith.constant 0 : i32
    %c0_i32_0 = arith.constant 0 : i32
    %c0_i32_1 = arith.constant 0 : i32
    return %c0_i32, %c0_i32_0 : i32, i32
  }
  func.func @transform_6(%arg0: i32) -> (i32, i32) {
    %c0_i32 = arith.constant 0 : i32
    %c0_i32_0 = arith.constant 0 : i32
    %c0_i32_1 = arith.constant 0 : i32
    return %c0_i32, %c0_i32_0 : i32, i32
  }
  func.func @transform_7(%arg0: i32) -> (i32, i32) {
    %c0_i32 = arith.constant 0 : i32
    %c0_i32_0 = arith.constant 0 : i32
    %c0_i32_1 = arith.constant 0 : i32
    return %c0_i32, %c0_i32_0 : i32, i32
  }
  func.func @transform_8(%arg0: i32) -> (i32, i32) {
    %c0_i32 = arith.constant 0 : i32
    %c0_i32_0 = arith.constant 0 : i32
    %c0_i32_1 = arith.constant 0 : i32
    return %c0_i32, %c0_i32_0 : i32, i32
  }
  func.func @transform_9(%arg0: i32) -> (i32, i32) {
    %c0_i32 = arith.constant 0 : i32
    %c0_i32_0 = arith.constant 0 : i32
    %c0_i32_1 = arith.constant 0 : i32
    return %c0_i32, %c0_i32_0 : i32, i32
  }
  func.func @transform_10(%arg0: i32) -> (i32, i32) {
    %c0_i32 = arith.constant 0 : i32
    %c0_i32_0 = arith.constant 0 : i32
    %c0_i32_1 = arith.constant 0 : i32
    return %c0_i32, %c0_i32_0 : i32, i32
  }
  func.func @transform_11(%arg0: i32) -> (i32, i32) {
    %c0_i32 = arith.constant 0 : i32
    %c0_i32_0 = arith.constant 0 : i32
    %c0_i32_1 = arith.constant 0 : i32
    return %c0_i32, %c0_i32_0 : i32, i32
  }
  func.func @transform_12(%arg0: i32) -> (i32, i32) {
    %c0_i32 = arith.constant 0 : i32
    %c0_i32_0 = arith.constant 0 : i32
    %c0_i32_1 = arith.constant 0 : i32
    return %c0_i32, %c0_i32_0 : i32, i32
  }
  func.func @transform_13(%arg0: i32) -> (i32, i32) {
    %c0_i32 = arith.constant 0 : i32
    %c0_i32_0 = arith.constant 0 : i32
    return %c0_i32, %arg0 : i32, i32
  }
}

</mosaic_0001>

<bundles_post_ra>
// kernel: output_block_forward.1
= control target key start
LH: loop header
LB: loop body
LE: loop exit
PB: predicated region body
PF: predicated region fallthrough
CT: control target
= control target key end

     0   :  { %s1921_s0 = inlined_call_operand.vmem [shape: bf16[24,256], index: 0, kind: input, shape index: {}]   ;;  %s1922_s1 = inlined_call_operand.vmem [shape: bf16[32,24], index: 1, kind: input, shape index: {}]   ;;  %s1923_s2 = inlined_call_operand.vmem [shape: bf16[32,24], index: 2, kind: input, shape index: {}]   ;;  %s1924_s3 = inlined_call_operand.vmem [shape: f32[32,1], index: 3, kind: input, shape index: {}]   ;;  %s1925_s4 = inlined_call_operand.vmem [shape: f32[32,1], index: 4, kind: input, shape index: {}]   ;;  %s1926_s5 = inlined_call_operand.vmem [shape: f32[32,128], index: 5, kind: input, shape index: {}]   ;;  %s1927_s6 = inlined_call_operand.vmem [shape: f32[32,128], index: 6, kind: input, shape index: {}]   ;;  %s1928_s7 = inlined_call_operand.vmem [shape: f32[128,8], index: 7, kind: input, shape index: {}]   ;;  %s1929_s8 = inlined_call_operand.vmem [shape: f32[8,128], index: 8, kind: input, shape index: {}]   ;;  %s1930_s9 = inlined_call_operand.vmem [shape: bf16[16,32], index: 9, kind: input, shape index: {}]   ;;  %s1931_s10 = inlined_call_operand.vmem [shape: f32[16,1], index: 10, kind: input, shape index: {}]   ;;  %s1932_s11 = inlined_call_operand.vmem [shape: bf16[1,16], index: 11, kind: input, shape index: {}]   ;;  %s1933_s12 = inlined_call_operand.<no memory space> [shape: f32[1,1], index: 12, kind: input, shape index: {}]   ;;  %s1934_s13 = inlined_call_operand.vmem [shape: f32[1,256], index: 13, kind: output, shape index: {}]  }
   0x1   :  { %v18_v0 = vstv %s1933_s12 }
   0x2   :  { %19 = vst [vmem:[#allocation2] sm:$0x1] %v18_v0 }
   0x3   :  { %s1700_s27 = smov 0   ;;  %s1702_s28 = smov 0  }
   0x4   :  { %s1704_s29 = smov 0  }
   0x5 LB: > { %s1324_s12 = sadd.s32 4294967295, %s1622_s29   ;;  %s1717_s30 = sadd.s32 1, %s1622_s29   ;;  %s1622_s29 = sphi %s1704_s29, %s1937_s29   ;;  %s1618_s28 = sphi %s1702_s28, %s1936_s28   ;;  %s1614_s27 = sphi %s1700_s27, %s1935_s27  }
   0x6   : > { %s29_s14 = ssub.s32 %s1622_s29, %s1717_s30  ;;  %s32_s15 = sadd.s32 1, %s1618_s28 }
   0x7   : > { %p30_p0 = scmp.eq.s32.totalorder %s29_s14, 0  ;;  %p39_p1 = scmp.ne.s32.totalorder %s1618_s28, %s1614_s27 }
   0x8   : > { %p40_p2 = scmp.eq.s32.totalorder %s1622_s29, 0  ;;  %p1327_p4 = scmp.ge.s32.totalorder %s1622_s29, 2 }
   0x9   : > { %s1726_s16 = scalar_select %p30_p0, %s1618_s28, %s32_s15  }
   0xa   : > { %p41_p3 = por %p40_p2, %p39_p1  ;;  %379 = sbr.rel (%p1327_p4) target bundleno = 22 (0x16), region = 64 }
   0xf   : > { %382 = sbr.rel (!%p41_p3) target bundleno = 22 (0x16), region = 68  ;;  %s384_s17 = sand.u32 (%p41_p3), 1, %s1618_s28  }
  0x10   : > { %s1328_s18 = sshll.u32 (%p41_p3), %s1622_s29, 2  ;;  %s1544_s19 = smul.u32 (%p41_p3), 12, %s384_s17 }
  0x11   : > { %s388_s22 = scalar_lea.vmem (%p41_p3), %s1921_s0, %s1328_s18 }
  0x12   : > { %v405_v1 = vld [vmem:[%s388_s22] sm:$0xf] (%p41_p3)  ;;  %v407_v2 = vld [vmem:[%s388_s22 + $0x8] sm:$0xf] (%p41_p3)  ;;  %v409_v3 = vld [vmem:[%s388_s22 + $0x10] sm:$0xf] (%p41_p3) }
  0x13   : > { %s386_s23 = scalar_lea.vmem (%p41_p3), [#allocation3], %s1544_s19 }
  0x14   : > { %406 = vst [vmem:[%s386_s23] sm:$0xf] %v405_v1  ;;  %408 = vst [vmem:[%s386_s23 + $0x4] sm:$0xf] %v407_v2 }
  0x15   : > { %410 = vst [vmem:[%s386_s23 + $0x8] sm:$0xf] %v409_v3 }
  0x16 PF: > { %p1329_p5 = scmp.ge.s32.totalorder %s1622_s29, 1  ;;  %p439_p6 = scmp.lt.s32.totalorder %s1622_s29, 3 }
  0x18   : > { %p440_p7 = pnand %p1329_p5, %p439_p6 }
  0x19   : > { %s446_s24 = sand.u32 (!%p440_p7), 1, %s1614_s27   ;;  %p487_p8 = scmp.lt.s32.totalorder (!%p440_p7), %s1324_s12, 1 }
  0x1a   : > { %443 = sbr.rel (%p440_p7) target bundleno = 1134 (0x46e), region = 109 }
  0x1b   : > { %s1545_s25 = smul.u32 (!%p440_p7), 12, %s446_s24 }
  0x1d   : > { %s448_s18 = scalar_lea.vmem (!%p440_p7), [#allocation3], %s1545_s25 }
  0x1f   : > { %v1577_v4 = vld [vmem:[%s1922_s1] sm:$0xff]   ;;  %vm541_vm0 = vcmask 195584   ;;  %vm548_vm1 = vcmask 1043456   ;;  %v1575_v6 = vld [vmem:[%s448_s18 + $0x8] ss:$0 sps:$4 sm:$0xff]   ;;  %v1624_v11 = vmov 0  }
  0x20   : > { %v1578_v5 = vld [vmem:[%s1923_s2] sm:$0xff]   ;;  %1424 = vmatprep.mubr.msk.bf16.mxu0 %vm541_vm0, %v1577_v4  ;;  %1542 = vmatprep.subr.msk.bf16.mxu0 %vm548_vm1, %v1575_v6  ;;  %v550_v8 = vsel %vm548_vm1, %v1575_v6, 0  ;;  %v607_v10 = vld [vmem:[%s1925_s4 + $0x10] sm:$0xff]  ;;  %v1579_v12 = vld [vmem:[%s1922_s1 + $0x8] sm:$0xff]   ;;  %vm912_vm2 = vcmask 64512   ;;  %vm1626_vm3 = vmmov 0  }
  0x21   : > { %1432 = vmatprep.mubr.msk.bf16.mxu1 %vm541_vm0, %v1578_v5  ;;  %v1576_v7 = vld [vmem:[%s448_s18] sm:$0xff]   ;;  %1543 = vmatprep.subr.msk.bf16.mxu1 %vm548_vm1, %v1575_v6  ;;  %v608_v15 = vld [vmem:[%s1925_s4 + $0x18] sm:$0xff]  ;;  %v1216_v22 = vld [vmem:[#allocation2] sm:$0x1]  ;;  %vm1167_vm4 = vcmask 261120   ;;  %vm1226_vm5 = vcmask 130048  }
  0x22   : > { %1421 = vmatpush3.bf16.msra.mxu0 %v550_v8  ;;  %1429 = vmatpush3.bf16.msra.mxu1 %v550_v8  ;;  %v605_v9 = vld [vmem:[%s1925_s4] sm:$0xff]  ;;  %v1580_v13 = vld [vmem:[%s1923_s2 + $0x8] sm:$0xff]   ;;  %v500_v18 = vld [vmem:[%s1924_s3 + $0x10] sm:$0xff]  ;;  %s1939_s12 = smov (!%p487_p8, %s1324_s12), 1 }
  0x23   : > { %1422 = vmatprep.subr.bf16.mxu0 %v1576_v7  ;;  %1430 = vmatprep.subr.bf16.mxu1 %v1576_v7  ;;  %v606_v14 = vld [vmem:[%s1925_s4 + $0x8] sm:$0xff]  ;;  %v498_v16 = vld [vmem:[%s1924_s3] sm:$0xff]  ;;  %v501_v19 = vld [vmem:[%s1924_s3 + $0x18] sm:$0xff]  ;;  %s489_s20 = scalar_lea.vmem %s1934_s13, %s1939_s12 }
  0x24   : > { %1573 = vset.pattern.permute.xlu0 %v1624_v11  ;;  %1574 = vset.pattern.permute.xlu1 %v1624_v11  ;;  %v499_v17 = vld [vmem:[%s1924_s3 + $0x8] sm:$0xff]  ;;  %v1150_v20 = vld [vmem:[%s1931_s10] sm:$0xff]  ;;  %v737_v23 = vld [vmem:[%s1928_s7 + $0x78] sm:$0xff] }
  0x25   : > { %611 = vperm.xlu0 %1573, %v605_v9   ;;  %621 = vperm.xlu1 %1574, %v607_v10   ;;  %v1151_v21 = vld [vmem:[%s1931_s10 + $0x8] sm:$0xff]  ;;  %v736_v24 = vld [vmem:[%s1928_s7 + $0x70] sm:$0xff]  ;;  %v734_v26 = vld [vmem:[%s1928_s7 + $0x60] sm:$0xff] }
  0x26   : > { %1423 = vmatpush3.bf16.msra.mxu0 %v1576_v7  ;;  %1431 = vmatpush3.bf16.msra.mxu1 %v1576_v7  ;;  %v735_v25 = vld [vmem:[%s1928_s7 + $0x68] sm:$0xff]  ;;  %v733_v27 = vld [vmem:[%s1928_s7 + $0x58] sm:$0xff]  ;;  %v732_v28 = vld [vmem:[%s1928_s7 + $0x50] sm:$0xff] }
  0x27   : > { %1436 = vmatprep.subr.mxu0 %v737_v23  ;;  %1474 = vmatprep.subr.mxu1 %v737_v23  ;;  %v731_v29 = vld [vmem:[%s1928_s7 + $0x48] sm:$0xff]  ;;  %v730_v30 = vld [vmem:[%s1928_s7 + $0x40] sm:$0xff]  ;;  %v729_v31 = vld [vmem:[%s1928_s7 + $0x38] sm:$0xff] }
  0x28   : > { %v728_v32 = vld [vmem:[%s1928_s7 + $0x30] sm:$0xff]  ;;  %v727_v33 = vld [vmem:[%s1928_s7 + $0x28] sm:$0xff]  ;;  %v726_v34 = vld [vmem:[%s1928_s7 + $0x20] sm:$0xff] }
  0x29   : > { %1425 = vmatmul.mubr.msk.bf16.vlgmr.msra.gmra.mxu0 %vm541_vm0, %v1579_v12  ;;  %1433 = vmatmul.mubr.msk.bf16.vlgmr.msra.gmra.mxu1 %vm541_vm0, %v1580_v13  ;;  %v725_v35 = vld [vmem:[%s1928_s7 + $0x18] sm:$0xff]  ;;  %v724_v36 = vld [vmem:[%s1928_s7 + $0x10] sm:$0xff]  ;;  %v723_v37 = vld [vmem:[%s1928_s7 + $0x8] sm:$0xff] }
  0x2a   : > { %616 = vperm.xlu0 %1573, %v606_v14   ;;  %626 = vperm.xlu1 %1574, %v608_v15   ;;  %v722_v38 = vld [vmem:[%s1928_s7] sm:$0xff] }
  0x2b   : > { %1437 = vmatpush3.msra.mxu0 %v737_v23  ;;  %1475 = vmatpush3.msra.mxu1 %v737_v23  ;;  %v945_v23 = vld [vmem:[%s1929_s8] sm:$0xff] }
  0x2c   : > { %1438 = vmatprep.subr.mxu0 %v736_v24  ;;  %1476 = vmatprep.subr.mxu1 %v736_v24 }
  0x2d   : > { %1439 = vmatpush3.msra.mxu0 %v736_v24  ;;  %1477 = vmatpush3.msra.mxu1 %v736_v24 }
  0x2e   : > { %504 = vperm.xlu0 %1573, %v498_v16   ;;  %509 = vperm.xlu1 %1574, %v499_v17  }
  0x2f   : > { %1440 = vmatprep.subr.mxu0 %v735_v25  ;;  %1478 = vmatprep.subr.mxu1 %v735_v25 }
  0x30   : > { %1441 = vmatpush3.msra.mxu0 %v735_v25  ;;  %1479 = vmatpush3.msra.mxu1 %v735_v25 }
  0x31   : > { %1442 = vmatprep.subr.mxu0 %v734_v26  ;;  %1480 = vmatprep.subr.mxu1 %v734_v26 }
  0x32   : > { %514 = vperm.xlu0 %1573, %v500_v18   ;;  %519 = vperm.xlu1 %1574, %v501_v19  }
  0x33   : > { %1443 = vmatpush3.msra.mxu0 %v734_v26  ;;  %1481 = vmatpush3.msra.mxu1 %v734_v26 }
  0x34   : > { %1444 = vmatprep.subr.mxu0 %v733_v27  ;;  %1482 = vmatprep.subr.mxu1 %v733_v27 }
  0x35   : > { %1445 = vmatpush3.msra.mxu0 %v733_v27  ;;  %1483 = vmatpush3.msra.mxu1 %v733_v27 }
  0x36   : > { %1154 = vperm.xlu0 %1573, %v1150_v20   ;;  %1159 = vperm.xlu1 %1574, %v1151_v21  }
  0x37   : > { %1446 = vmatprep.subr.mxu0 %v732_v28  ;;  %1484 = vmatprep.subr.mxu1 %v732_v28 }
  0x38   : > { %1447 = vmatpush3.msra.mxu0 %v732_v28  ;;  %1485 = vmatpush3.msra.mxu1 %v732_v28 }
  0x39   : > { %1448 = vmatprep.subr.mxu0 %v731_v29  ;;  %1486 = vmatprep.subr.mxu1 %v731_v29 }
  0x3a   : > { %1219 = vperm.xlu0 %1573, %v1216_v22   ;;  %1449 = vmatpush3.msra.mxu0 %v731_v29 }
  0x3b   : > { %1487 = vmatpush3.msra.mxu1 %v731_v29  ;;  %1450 = vmatprep.subr.mxu0 %v730_v30 }
  0x3c   : > { %1488 = vmatprep.subr.mxu1 %v730_v30  ;;  %1451 = vmatpush3.msra.mxu0 %v730_v30 }
  0x3d   : > { %1489 = vmatpush3.msra.mxu1 %v730_v30  ;;  %1452 = vmatprep.subr.mxu0 %v729_v31 }
  0x3e   : > { %1490 = vmatprep.subr.mxu1 %v729_v31  ;;  %1453 = vmatpush3.msra.mxu0 %v729_v31 }
  0x3f   : > { %1491 = vmatpush3.msra.mxu1 %v729_v31  ;;  %1454 = vmatprep.subr.mxu0 %v728_v32 }
  0x40   : > { %1492 = vmatprep.subr.mxu1 %v728_v32  ;;  %1455 = vmatpush3.msra.mxu0 %v728_v32 }
  0x41   : > { %1493 = vmatpush3.msra.mxu1 %v728_v32  ;;  %1456 = vmatprep.subr.mxu0 %v727_v33 }
  0x42   : > { %1494 = vmatprep.subr.mxu1 %v727_v33  ;;  %1457 = vmatpush3.msra.mxu0 %v727_v33 }
  0x43   : > { %1495 = vmatpush3.msra.mxu1 %v727_v33  ;;  %1458 = vmatprep.subr.mxu0 %v726_v34 }
  0x44   : > { %1496 = vmatprep.subr.mxu1 %v726_v34  ;;  %1459 = vmatpush3.msra.mxu0 %v726_v34 }
  0x45   : > { %1497 = vmatpush3.msra.mxu1 %v726_v34  ;;  %1460 = vmatprep.subr.mxu0 %v725_v35 }
  0x46   : > { %1498 = vmatprep.subr.mxu1 %v725_v35  ;;  %1461 = vmatpush3.msra.mxu0 %v725_v35 }
  0x47   : > { %1499 = vmatpush3.msra.mxu1 %v725_v35  ;;  %1462 = vmatprep.subr.mxu0 %v724_v36 }
  0x48   : > { %1500 = vmatprep.subr.mxu1 %v724_v36  ;;  %1463 = vmatpush3.msra.mxu0 %v724_v36 }
  0x49   : > { %1501 = vmatpush3.msra.mxu1 %v724_v36  ;;  %1464 = vmatprep.subr.mxu0 %v723_v37 }
  0x4a   : > { %1502 = vmatprep.subr.mxu1 %v723_v37  ;;  %1465 = vmatpush3.msra.mxu0 %v723_v37 }
  0x4b   : > { %1503 = vmatpush3.msra.mxu1 %v723_v37  ;;  %1466 = vmatprep.subr.mxu0 %v722_v38 }
  0x4c   : > { %1504 = vmatprep.subr.mxu1 %v722_v38  ;;  %1467 = vmatpush3.msra.mxu0 %v722_v38 }
  0x4d   : > { %1505 = vmatpush3.msra.mxu1 %v722_v38  ;;  %1512 = vmatprep.subr.mxu0 %v945_v23 }
  0x4e   : > { %1520 = vmatprep.subr.mxu1 %v945_v23 }
  0xa0   : > { %v622_v39 = vpop.permute.xlu1 %621  ;;  %v612_v40 = vpop.permute.xlu0 %611 }
  0xa5   : > { %v627_v46 = vpop.permute.xlu1 %626  ;;  %v617_v50 = vpop.permute.xlu0 %616 }
  0xa9   : > { %v505_v1 = vpop.permute.xlu0 %504  ;;  %v510_v3 = vpop.permute.xlu1 %509 }
  0xad   : > { %v515_v8 = vpop.permute.xlu0 %514  ;;  %v520_v15 = vpop.permute.xlu1 %519 }
  0xe9   : > { %v1434_v41 = vpop.f32.mrf.mxu1  ;;  %v1426_v62 = vpop.f32.mrf.mxu0 }
  0xea   : > { %v688_v42 = vadd.f32 %v1434_v41, %v622_v39  ;;  %v595_v10 = vadd.f32 %v1426_v62, %v515_v8 }
  0xeb   : > { %v679_v43 = vpop.f32.mrf.mxu1  ;;  %v586_v0 = vpop.f32.mrf.mxu0 }
  0xec   : > { %v1342_v44 = vmul.f32 -1.442695, %v688_v42  ;;  %v680_v45 = vadd.f32 %v679_v43, %v612_v40  ;;  %v587_v4 = vadd.f32 %v586_v0, %v505_v1  ;;  %v1625_v0 = vmov 0.0  }
  0xed   : > { %v1435_v47 = vpop.f32.mrf.mxu1  ;;  %v1427_v2 = vpop.f32.mrf.mxu0 }
  0xee   : > { %1582 = vpow2.f32 %v1342_v44  ;;  %v1340_v48 = vmul.f32 -1.442695, %v680_v45  ;;  %v691_v49 = vadd.f32 %v1435_v47, %v627_v46  ;;  %v598_v17 = vadd.f32 %v1427_v2, %v520_v15 }
  0xef   : > { %v682_v51 = vpop.f32.mrf.mxu1  ;;  %v589_v6 = vpop.f32.mrf.mxu0 }
  0xf0   : > { %1584 = vpow2.f32 %v1340_v48  ;;  %v1343_v52 = vmul.f32 -1.442695, %v691_v49  ;;  %v683_v53 = vadd.f32 %v682_v51, %v617_v50  ;;  %v590_v12 = vadd.f32 %v589_v6, %v510_v3 }
  0xf2   : > { %1586 = vpow2.f32 %v1343_v52  ;;  %v1341_v54 = vmul.f32 -1.442695, %v683_v53 }
  0xf4   : > { %1588 = vpow2.f32 %v1341_v54 }
  0xfb   : > { %v1583_v55 = vpop.eup %1582 }
  0xfc   : > { %v708_v57 = vadd.f32 1.0, %v1583_v55 }
  0xfd   : > { %v1585_v56 = vpop.eup %1584 }
  0xfe   : > { %v706_v58 = vadd.f32 1.0, %v1585_v56 }
  0xff   : > { %v1587_v59 = vpop.eup %1586 }
 0x100   : > { %1590 = vrcp.f32 %v706_v58  ;;  %v709_v60 = vadd.f32 1.0, %v1587_v59 }
 0x101   : > { %v1589_v61 = vpop.eup %1588  ;;  %1592 = vrcp.f32 %v708_v57 }
 0x102   : > { %v707_v63 = vadd.f32 1.0, %v1589_v61  ;;  %1594 = vrcp.f32 %v709_v60 }
 0x104   : > { %1596 = vrcp.f32 %v707_v63 }
 0x10d   : > { %v1591_v5 = vpop.eup %1590 }
 0x10e   : > { %v1593_v7 = vpop.eup %1592  ;;  %v1831_v9 = vmul.f32 %v1591_v5, %v587_v4 }
 0x10f   : > { %v1595_v11 = vpop.eup %1594  ;;  %v1836_v16 = vmul.f32 %v1593_v7, %v595_v10 }
 0x110   : > { %1468 = vmatprep.mubr.f32.mxu0 %v1831_v9  ;;  %v823_v13 = vmul.f32 %v1831_v9, %v1831_v9  ;;  %v1843_v20 = vmul.f32 %v1595_v11, %v598_v17  ;;  %v1133_v11 = vld [vmem:[%s1926_s5 + $0x18] sm:$0xff]  ;;  %v1130_v17 = vld [vmem:[%s1926_s5] sm:$0xff] }
 0x111   : > { %v1597_v14 = vpop.eup %1596  ;;  %v825_v21 = vmul.f32 %v1836_v16, %v1836_v16 }
 0x112   : > { %1506 = vmatprep.mubr.f32.mxu1 %v823_v13  ;;  %v1838_v18 = vmul.f32 %v1597_v14, %v590_v12  ;;  %v826_v22 = vmul.f32 %v1843_v20, %v1843_v20 }
 0x114   : > { %1469 = vmatmul.mubr.f32.vlgmr.msra.gmra.mxu0 %v1838_v18  ;;  %v824_v19 = vmul.f32 %v1838_v18, %v1838_v18 }
 0x115   : > { %1471 = vmatprep.mubr.f32.mxu0 %v1836_v16  ;;  %1513 = vmatpush3.msra.mxu0 %v945_v23 }
 0x116   : > { %1507 = vmatmul.mubr.f32.vlgmr.msra.gmra.mxu1 %v824_v19  ;;  %1528 = vmatprep.subr.bf16.mxu0 %v1625_v0 }
 0x117   : > { %1509 = vmatprep.mubr.f32.mxu1 %v825_v21  ;;  %1521 = vmatpush3.msra.mxu1 %v945_v23  ;;  %v1140_v23 = vld [vmem:[%s1927_s6 + $0x10] sm:$0xff] }
 0x118   : > { %1472 = vmatmul.mubr.f32.gmra.mxu0 %v1843_v20  ;;  %1536 = vmatprep.subr.bf16.mxu1 %v1625_v0 }
 0x11a   : > { %1510 = vmatmul.mubr.f32.gmra.mxu1 %v826_v22 }
 0x1d4   : > { %v1470_v24 = vpop.f32.mrf.mxu0 }
 0x1d5   : > { %v914_v30 = vsel %vm912_vm2, %v1470_v24, 0.0 }
 0x1d6   : > { %v804_v25 = vpop.f32.mrf.mxu0  ;;  %v1508_v26 = vpop.f32.mrf.mxu1 }
 0x1d7   : > { %v913_v27 = vsel %vm912_vm2, %v804_v25, 0.0  ;;  %v928_v35 = vsel %vm912_vm2, %v1508_v26, 0.0  ;;  %v1138_v26 = vld [vmem:[%s1927_s6] sm:$0xff] }
 0x1d8   : > { %v1473_v28 = vpop.f32.mrf.mxu0  ;;  %v893_v29 = vpop.f32.mrf.mxu1  ;;  %v915_v32 = vadd.f32 %v914_v30, %v913_v27  ;;  %v1139_v30 = vld [vmem:[%s1927_s6 + $0x8] sm:$0xff] }
 0x1d9   : > { %v927_v31 = vsel %vm912_vm2, %v893_v29, 0.0  ;;  %v918_v40 = vsel %vm912_vm2, %v1473_v28, 0.0 }
 0x1da   : > { %v814_v33 = vpop.f32.mrf.mxu0  ;;  %v1511_v34 = vpop.f32.mrf.mxu1  ;;  %v929_v37 = vadd.f32 %v928_v35, %v927_v31  ;;  %v1581_v35 = vld [vmem:[%s1930_s9] sm:$0xff]  }
 0x1db   : > { %v916_v36 = vsel %vm912_vm2, %v814_v33, 0.0  ;;  %v932_v44 = vsel %vm912_vm2, %v1511_v34, 0.0 }
 0x1dc   : > { %v917_v38 = vadd.f32 %v916_v36, %v915_v32  ;;  %v903_v39 = vpop.f32.mrf.mxu1 }
 0x1dd   : > { %v930_v41 = vsel %vm912_vm2, %v903_v39, 0.0 }
 0x1de   : > { %v919_v42 = vadd.f32 %v918_v40, %v917_v38  ;;  %v931_v43 = vadd.f32 %v930_v41, %v929_v37  ;;  %v1155_v37 = vpop.permute.xlu0 %1154  ;;  %v1160_v40 = vpop.permute.xlu1 %1159 }
 0x1e0   : > { %v920_v45 = vrot.slane %v919_v42, 4  ;;  %v933_v46 = vadd.f32 %v932_v44, %v931_v43 }
 0x1e2   : > { %v921_v47 = vadd.f32 %v920_v45, %v919_v42  ;;  %v934_v48 = vrot.slane %v933_v46, 4 }
 0x1e4   : > { %v922_v49 = vrot.slane %v921_v47, 2  ;;  %v935_v50 = vadd.f32 %v934_v48, %v933_v46  ;;  %v1222_v48 = vlaneseq }
 0x1e6   : > { %v923_v51 = vadd.f32 %v922_v49, %v921_v47  ;;  %v936_v52 = vrot.slane %v935_v50, 2  ;;  %v1214_v47 = vld [vmem:[%s1932_s11] sm:$0x1]  ;;  %v1223_v49 = vshrl.u32 %v1222_v48, 7 }
 0x1e8   : > { %v924_v53 = vrot.slane %v923_v51, 1  ;;  %v937_v54 = vadd.f32 %v936_v52, %v935_v50  ;;  %v1224_v50 = vsub.s32 0, %v1223_v49 }
 0x1ea   : > { %v925_v55 = vadd.f32 %v924_v53, %v923_v51  ;;  %v938_v56 = vrot.slane %v937_v54, 1  ;;  %v1220_v51 = vpop.permute.xlu0 %1219 }
 0x1eb   : > { %v1225_v52 = vrot.slane %v1220_v51, %v1224_v50 }
 0x1ec   : > { %v926_v57 = vmul.f32 0.001953125, %v925_v55  ;;  %v939_v58 = vadd.f32 %v938_v56, %v937_v54 }
 0x1ee   : > { %v940_v59 = vmul.f32 0.001953125, %v939_v58  ;;  %v941_v60 = vmul.f32 %v926_v57, %v926_v57  ;;  %1514 = vmatprep.mubr.msk.f32.mxu0 %vm912_vm2, %v926_v57 }
 0x1ef   : > { %1515 = vmatmul.mubr.msk.f32.vlgmr.msra.gmra.mxu0 %vm912_vm2, %v926_v57 }
 0x1f0   : > { %v942_v61 = vsub.f32 %v940_v59, %v941_v60  ;;  %1517 = vmatprep.mubr.msk.f32.mxu0 %vm912_vm2, %v926_v57 }
 0x1f2   : > { %v943_v62 = vadd.f32 1e-05, %v942_v61 }
 0x1f3   : > { %1518 = vmatmul.mubr.msk.f32.gmra.mxu0 %vm912_vm2, %v926_v57 }
 0x1f4   : > { %1598 = vrsqrt.f32 %v943_v62  ;;  %1532 = vmatprep.mubr.msk.bf16.mxu0 %vm1626_vm3, %v1625_v0 }
 0x201   : > { %v1599_v63 = vpop.eup %1598 }
 0x202   : > { %1522 = vmatprep.mubr.msk.f32.mxu1 %vm912_vm2, %v1599_v63 }
 0x203   : > { %1523 = vmatmul.mubr.msk.f32.vlgmr.msra.gmra.mxu1 %vm912_vm2, %v1599_v63 }
 0x204   : > { %1525 = vmatprep.mubr.msk.f32.mxu1 %vm912_vm2, %v1599_v63 }
 0x207   : > { %1526 = vmatmul.mubr.msk.f32.gmra.mxu1 %vm912_vm2, %v1599_v63 }
 0x208   : > { %1538 = vmatprep.mubr.msk.bf16.mxu1 %vm1626_vm3, %v1625_v0 }
 0x2af   : > { %v1516_v1 = vpop.f32.mrf.mxu0 }
 0x2b0   : > { %v1123_v12 = vsub.f32 %v1838_v18, %v1516_v1  ;;  %v1131_v18 = vld [vmem:[%s1926_s5 + $0x8] sm:$0xff] }
 0x2b1   : > { %v1015_v2 = vpop.f32.mrf.mxu0 }
 0x2b2   : > { %v1122_v7 = vsub.f32 %v1831_v9, %v1015_v2  ;;  %v1132_v9 = vld [vmem:[%s1926_s5 + $0x10] sm:$0xff] }
 0x2b3   : > { %v1519_v3 = vpop.f32.mrf.mxu0 }
 0x2b4   : > { %v1125_v8 = vsub.f32 %v1843_v20, %v1519_v3 }
 0x2b5   : > { %v1025_v5 = vpop.f32.mrf.mxu0 }
 0x2b6   : > { %v1124_v13 = vsub.f32 %v1836_v16, %v1025_v5  ;;  %v1141_v16 = vld [vmem:[%s1927_s6 + $0x18] sm:$0xff] }
 0x2c3   : > { %v1524_v4 = vpop.f32.mrf.mxu1 }
 0x2c4   : > { %v1127_v20 = vmul.f32 %v1524_v4, %v1123_v12 }
 0x2c5   : > { %v1103_v6 = vpop.f32.mrf.mxu1 }
 0x2c6   : > { %v1126_v14 = vmul.f32 %v1122_v7, %v1103_v6  ;;  %v1135_v27 = vmul.f32 %v1131_v18, %v1127_v20 }
 0x2c7   : > { %v1527_v10 = vpop.f32.mrf.mxu1 }
 0x2c8   : > { %v1129_v15 = vmul.f32 %v1527_v10, %v1125_v8  ;;  %v1134_v24 = vmul.f32 %v1130_v17, %v1126_v14  ;;  %v1143_v33 = vadd.f32 %v1139_v30, %v1135_v27 }
 0x2c9   : > { %v1113_v19 = vpop.f32.mrf.mxu1 }
 0x2ca   : > { %v1137_v21 = vmul.f32 %v1133_v11, %v1129_v15  ;;  %v1128_v22 = vmul.f32 %v1124_v13, %v1113_v19  ;;  %v1142_v31 = vadd.f32 %v1138_v26, %v1134_v24 }
 0x2cc   : > { %v1136_v25 = vmul.f32 %v1132_v9, %v1128_v22  ;;  %v1145_v28 = vadd.f32 %v1141_v16, %v1137_v21  ;;  %v1148_v34 = vpack.c.bf16 %v1143_v33, %v1142_v31 }
 0x2ce   : > { %v1144_v29 = vadd.f32 %v1140_v23, %v1136_v25 }
 0x2d0   : > { %v1149_v32 = vpack.c.bf16 %v1145_v28, %v1144_v29 }
 0x2d2   : > { %1529 = vmatpush3.bf16.msra.mxu0 %v1149_v32 }
 0x2d3   : > { %1530 = vmatprep.subr.bf16.mxu0 %v1625_v0 }
 0x2d6   : > { %1531 = vmatpush3.bf16.msra.mxu0 %v1148_v34 }
 0x2d9   : > { %1533 = vmatmul.mubr.msk.bf16.vlgmr.msra.gmra.mxu0 %vm1167_vm4, %v1581_v35 }
 0x399   : > { %v1205_v36 = vpop.f32.mrf.mxu0 }
 0x39a   : > { %v1206_v39 = vadd.f32 %v1205_v36, %v1155_v37 }
 0x39b   : > { %v1534_v38 = vpop.f32.mrf.mxu0 }
 0x39c   : > { %v1212_v44 = vmax.f32 %v1206_v39, 0.0 }
 0x39d   : > { %v1208_v41 = vpop.f32.mrf.mxu0 }
 0x39e   : > { %v1209_v42 = vadd.f32 %v1208_v41, %v1160_v40 }
 0x39f   : > { %v1535_v43 = vpop.f32.mrf.mxu0 }
 0x3a0   : > { %v1213_v45 = vmax.f32 %v1209_v42, 0.0 }
 0x3a2   : > { %v1215_v46 = vpack.c.bf16 %v1213_v45, %v1212_v44 }
 0x3a4   : > { %1537 = vmatpush3.bf16.msra.mxu1 %v1215_v46 }
 0x3a7   : > { %1539 = vmatmul.mubr.msk.bf16.vlgmr.msra.gmra.mxu1 %vm1226_vm5, %v1214_v47 }
 0x467   : > { %v1264_v53 = vpop.f32.mrf.mxu1 }
 0x468   : > { %v1265_v54 = vadd.f32 %v1264_v53, %v1225_v52 }
 0x469   : > { %v1540_v55 = vpop.f32.mrf.mxu1 }
 0x46a   : > { %1270 = vst [vmem:[%s489_s20] sm:$0x1] %v1265_v54 }
 0x46b   : > { %v1267_v56 = vpop.f32.mrf.mxu1 }
 0x46d   : > { %v1541_v57 = vpop.f32.mrf.mxu1 }
 0x46e PF: > { %p22_p9 = scmp.ge.s32.totalorder %s1717_s30, 4   ;;  %s1935_s27 = smov %s1618_s28 }
 0x46f   : > { %s1936_s28 = smov %s1726_s16  ;;  %s1937_s29 = smov %s1717_s30 }
 0x470   :  { %24 = sbr.rel (!%p22_p9) target bundleno = 5 (0x5), region = 148 }

</bundles_post_ra>
